<compile_context>
chip_gen: v5e
topology: v5e:2x2
jax: 0.10.0
libtpu: 0.0.40
codegen_flags: <defaults>
</compile_context>

<pallas_src>
import functools

import jax
import jax.numpy as jnp
from jax.experimental import pallas as pl
from jax.experimental.pallas import tpu as pltpu

_LANES = 128        # padded fc2 width inside the kernel (MXU-friendly)
_NUM_CLASSES = 2    # real fc2 output features


def _testnet_kernel(x_ref, w1_ref, b1_ref, w2_ref, b2_ref, o_ref):
    # fc1 + ReLU: (tb, K) @ (K, H) with f32 MXU accumulation, f32 VPU epilogue.
    h = jnp.dot(x_ref[...], w1_ref[...], preferred_element_type=jnp.float32)
    h = jnp.maximum(h + b1_ref[...], 0.0)

    # fc2 with the output padded to 128 lanes in VMEM (pad columns of w2/b2
    # are zero; only lanes 0 and 1 are read below).
    logits = jnp.dot(h, w2_ref[...], preferred_element_type=jnp.float32)
    logits = logits + b2_ref[...]

    # Numerically stable 2-class softmax in closed form on the two real lanes
    # (pure elementwise math; no 128-lane cross-lane reductions).
    l = logits[:, 0:_NUM_CLASSES]              # (tb, 2)
    m = jnp.maximum(l[:, 0:1], l[:, 1:2])      # (tb, 1)
    e = jnp.exp(l - m)                         # (tb, 2)
    denom = e[:, 0:1] + e[:, 1:2]              # (tb, 1)
    o_ref[...] = (e / denom).astype(o_ref.dtype)


def _round_up(n, m):
    return ((n + m - 1) // m) * m


@functools.partial(jax.jit, static_argnames=("tb",))
def testnet_forward(x, w1, b1, w2, b2, *, tb=4096):
    """x:(B,10), w1:(10,64), b1:(1,64), w2:(64,2), b2:(1,2) -> (B,2) f32."""
    B, K = x.shape
    H = w1.shape[1]

    # Adapt the batch tile: large enough to amortize per-grid-step overhead
    # for big B, clamped to a multiple of 8 sublanes for small B.
    tb = max(8, min(tb, _round_up(B, 8)))
    grid = (pl.cdiv(B, tb),)

    xf = x.astype(jnp.float32)
    w1f = w1.astype(jnp.float32)
    b1f = b1.astype(jnp.float32).reshape(1, H)
    w2p = jnp.pad(w2.astype(jnp.float32),
                  ((0, 0), (0, _LANES - _NUM_CLASSES)))
    b2p = jnp.pad(b2.astype(jnp.float32).reshape(1, _NUM_CLASSES),
                  ((0, 0), (0, _LANES - _NUM_CLASSES)))

    cost = pl.CostEstimate(
        flops=2 * B * (K * H + H * _NUM_CLASSES),
        transcendentals=2 * B,
        bytes_accessed=(B * K * 4 + B * _NUM_CLASSES * 4
                        + K * H * 4 + H * 4 + H * _LANES * 4 + _LANES * 4),
    )

    return pl.pallas_call(
        _testnet_kernel,
        out_shape=jax.ShapeDtypeStruct((B, _NUM_CLASSES), jnp.float32),
        grid_spec=pltpu.PrefetchScalarGridSpec(
            num_scalar_prefetch=0,
            grid=grid,
            in_specs=[
                pl.BlockSpec((tb, K), lambda i: (i, 0)),      # x: streamed over B
                pl.BlockSpec((K, H), lambda i: (0, 0)),       # w1: VMEM-resident
                pl.BlockSpec((1, H), lambda i: (0, 0)),       # b1: VMEM-resident
                pl.BlockSpec((H, _LANES), lambda i: (0, 0)),  # w2 (lane-padded)
                pl.BlockSpec((1, _LANES), lambda i: (0, 0)),  # b2 (lane-padded)
            ],
            out_specs=pl.BlockSpec((tb, _NUM_CLASSES), lambda i: (i, 0)),
        ),
        compiler_params=pltpu.CompilerParams(
            dimension_semantics=("parallel",),   # megacore sharding on v7x
            vmem_limit_bytes=48 * 1024 * 1024,
        ),
        cost_estimate=cost,
    )(xf, w1f, b1f, w2p, b2p)


def _init_linear(key, fan_in, fan_out):
    # Mimic PyTorch nn.Linear default init: U(-1/sqrt(fan_in), 1/sqrt(fan_in)).
    kw, kb = jax.random.split(key)
    bound = 1.0 / jnp.sqrt(jnp.float32(fan_in))
    w = jax.random.uniform(kw, (fan_in, fan_out), jnp.float32, -bound, bound)
    b = jax.random.uniform(kb, (1, fan_out), jnp.float32, -bound, bound)
    return w, b


if __name__ == "__main__":
    key = jax.random.PRNGKey(0)
    k_x, k_fc1, k_fc2 = jax.random.split(key, 3)

    B = 8
    x = jax.random.normal(k_x, (B, 10), jnp.float32)

    w1, b1 = _init_linear(k_fc1, 10, 64)   # fc1: Linear(10, 64)
    w2, b2 = _init_linear(k_fc2, 64, 2)    # fc2: Linear(64, 2)

    out = jax.block_until_ready(testnet_forward(x, w1, b1, w2, b2))

    # Pure f32 reference mirroring the PyTorch forward.
    h_ref = jnp.maximum(jnp.dot(x, w1) + b1, 0.0)
    logits_ref = jnp.dot(h_ref, w2) + b2
    ref = jax.nn.softmax(logits_ref, axis=1)

    assert out.shape == (B, 2)
    assert jnp.allclose(out, ref, atol=5e-3, rtol=5e-3)
    assert jnp.allclose(jnp.sum(out, axis=1), 1.0, atol=1e-5)

    print("KERNEL_OK")
</pallas_src>

<mosaic_0001>
module attributes {stable_mosaic.version = 11 : i64} {
  func.func @_testnet_kernel(%arg0: i32, %arg1: memref<8x10xf32, #tpu.memory_space<vmem>>, %arg2: memref<10x64xf32, #tpu.memory_space<vmem>>, %arg3: memref<1x64xf32, #tpu.memory_space<vmem>>, %arg4: memref<64x128xf32, #tpu.memory_space<vmem>>, %arg5: memref<1x128xf32, #tpu.memory_space<vmem>>, %arg6: memref<8x2xf32, #tpu.memory_space<vmem>>) attributes {dimension_semantics = [#tpu.dimension_semantics<parallel>], iteration_bounds = array<i64: 1>, scalar_prefetch = 0 : i64, scratch_operands = 0 : i64, tpu.core_type = #tpu.core_type<tc>, window_params = [{transform_indices = @transform_0, window_bounds = array<i64: 8, 10>}, {pipeline_mode = #tpu.pipeline_mode<synchronous>, transform_indices = @transform_1, window_bounds = array<i64: 10, 64>}, {pipeline_mode = #tpu.pipeline_mode<synchronous>, transform_indices = @transform_2, window_bounds = array<i64: 1, 64>}, {pipeline_mode = #tpu.pipeline_mode<synchronous>, transform_indices = @transform_3, window_bounds = array<i64: 64, 128>}, {pipeline_mode = #tpu.pipeline_mode<synchronous>, transform_indices = @transform_4, window_bounds = array<i64: 1, 128>}, {transform_indices = @transform_5, window_bounds = array<i64: 8, 2>}]} {
    %c0 = arith.constant 0 : index
    %c0_0 = arith.constant 0 : index
    %0 = vector.load %arg1[%c0, %c0_0] : memref<8x10xf32, #tpu.memory_space<vmem>>, vector<8x10xf32>
    %c0_1 = arith.constant 0 : index
    %c0_2 = arith.constant 0 : index
    %1 = vector.load %arg2[%c0_1, %c0_2] : memref<10x64xf32, #tpu.memory_space<vmem>>, vector<10x64xf32>
    %cst = arith.constant dense<0.000000e+00> : vector<8x64xf32>
    %2 = tpu.matmul %0, %1, %cst {dimension_numbers = #tpu.dot_dimension_numbers<[1], [0], [0], [1], [0, 0, 1, 1], [], []>} : vector<8x10xf32>, vector<10x64xf32>, vector<8x64xf32> -> vector<8x64xf32>
    %c0_3 = arith.constant 0 : index
    %c0_4 = arith.constant 0 : index
    %3 = vector.load %arg3[%c0_3, %c0_4] : memref<1x64xf32, #tpu.memory_space<vmem>>, vector<1x64xf32>
    %4 = vector.broadcast %3 : vector<1x64xf32> to vector<8x64xf32>
    %5 = arith.addf %2, %4 : vector<8x64xf32>
    %cst_5 = arith.constant 0.000000e+00 : f32
    %6 = vector.broadcast %cst_5 : f32 to vector<8x64xf32>
    %7 = arith.maximumf %5, %6 : vector<8x64xf32>
    %c0_6 = arith.constant 0 : index
    %c0_7 = arith.constant 0 : index
    %8 = vector.load %arg4[%c0_6, %c0_7] : memref<64x128xf32, #tpu.memory_space<vmem>>, vector<64x128xf32>
    %cst_8 = arith.constant dense<0.000000e+00> : vector<8x128xf32>
    %9 = tpu.matmul %7, %8, %cst_8 {dimension_numbers = #tpu.dot_dimension_numbers<[1], [0], [0], [1], [0, 0, 1, 1], [], []>} : vector<8x64xf32>, vector<64x128xf32>, vector<8x128xf32> -> vector<8x128xf32>
    %c0_9 = arith.constant 0 : index
    %c0_10 = arith.constant 0 : index
    %10 = vector.load %arg5[%c0_9, %c0_10] : memref<1x128xf32, #tpu.memory_space<vmem>>, vector<1x128xf32>
    %11 = vector.broadcast %10 : vector<1x128xf32> to vector<8x128xf32>
    %12 = arith.addf %9, %11 : vector<8x128xf32>
    %13 = vector.extract_strided_slice %12 {offsets = [0, 0], sizes = [8, 2], strides = [1, 1]} : vector<8x128xf32> to vector<8x2xf32>
    %14 = vector.extract_strided_slice %13 {offsets = [0, 0], sizes = [8, 1], strides = [1, 1]} : vector<8x2xf32> to vector<8x1xf32>
    %15 = vector.extract_strided_slice %13 {offsets = [0, 1], sizes = [8, 1], strides = [1, 1]} : vector<8x2xf32> to vector<8x1xf32>
    %16 = arith.maximumf %14, %15 : vector<8x1xf32>
    %17 = vector.broadcast %16 : vector<8x1xf32> to vector<8x2xf32>
    %18 = arith.subf %13, %17 : vector<8x2xf32>
    %19 = math.exp %18 : vector<8x2xf32>
    %20 = vector.extract_strided_slice %19 {offsets = [0, 0], sizes = [8, 1], strides = [1, 1]} : vector<8x2xf32> to vector<8x1xf32>
    %21 = vector.extract_strided_slice %19 {offsets = [0, 1], sizes = [8, 1], strides = [1, 1]} : vector<8x2xf32> to vector<8x1xf32>
    %22 = arith.addf %20, %21 : vector<8x1xf32>
    %23 = vector.broadcast %22 : vector<8x1xf32> to vector<8x2xf32>
    %24 = arith.divf %19, %23 : vector<8x2xf32>
    %c0_11 = arith.constant 0 : index
    %c0_12 = arith.constant 0 : index
    %25 = vector.load %arg6[%c0_11, %c0_12] : memref<8x2xf32, #tpu.memory_space<vmem>>, vector<8x2xf32>
    tpu.vector_store %arg6[%c0_11, %c0_12], %24 {strides = array<i32>} : memref<8x2xf32, #tpu.memory_space<vmem>>, vector<8x2xf32>,
    return
  }
  func.func @transform_0(%arg0: i32) -> (i32, i32) {
    %c0_i32 = arith.constant 0 : i32
    %c0_i32_0 = arith.constant 0 : i32
    return %arg0, %c0_i32 : i32, i32
  }
  func.func @transform_1(%arg0: i32) -> (i32, i32) {
    %c0_i32 = arith.constant 0 : i32
    %c0_i32_0 = arith.constant 0 : i32
    %c0_i32_1 = arith.constant 0 : i32
    return %c0_i32, %c0_i32_0 : i32, i32
  }
  func.func @transform_2(%arg0: i32) -> (i32, i32) {
    %c0_i32 = arith.constant 0 : i32
    %c0_i32_0 = arith.constant 0 : i32
    %c0_i32_1 = arith.constant 0 : i32
    return %c0_i32, %c0_i32_0 : i32, i32
  }
  func.func @transform_3(%arg0: i32) -> (i32, i32) {
    %c0_i32 = arith.constant 0 : i32
    %c0_i32_0 = arith.constant 0 : i32
    %c0_i32_1 = arith.constant 0 : i32
    return %c0_i32, %c0_i32_0 : i32, i32
  }
  func.func @transform_4(%arg0: i32) -> (i32, i32) {
    %c0_i32 = arith.constant 0 : i32
    %c0_i32_0 = arith.constant 0 : i32
    %c0_i32_1 = arith.constant 0 : i32
    return %c0_i32, %c0_i32_0 : i32, i32
  }
  func.func @transform_5(%arg0: i32) -> (i32, i32) {
    %c0_i32 = arith.constant 0 : i32
    %c0_i32_0 = arith.constant 0 : i32
    return %arg0, %c0_i32 : i32, i32
  }
}

</mosaic_0001>

<bundles_post_ra>
// kernel: testnet_forward.1
= control target key start
LH: loop header
LB: loop body
LE: loop exit
PB: predicated region body
PF: predicated region fallthrough
CT: control target
= control target key end

     0   :  { %vm31_vm0 = vcmask 1041408   ;;  %vm27_vm1 = vcmask 80896   ;;  %vm68_vm2 = vcmask 523264   ;;  %s149_s17 = smov 127   ;;  %v150_v18 = vmov 0   ;;  %s223_s1 = inlined_call_operand.vmem [shape: f32[10,64], index: 1, kind: input, shape index: {}]   ;;  %s224_s0 = inlined_call_operand.vmem [shape: f32[8,10], index: 0, kind: input, shape index: {}]   ;;  %s225_s3 = inlined_call_operand.vmem [shape: f32[64,128], index: 3, kind: input, shape index: {}]   ;;  %s226_s2 = inlined_call_operand.vmem [shape: f32[1,64], index: 2, kind: input, shape index: {}]   ;;  %s227_s4 = inlined_call_operand.vmem [shape: f32[1,128], index: 4, kind: input, shape index: {}]   ;;  %s228_s5 = inlined_call_operand.vmem [shape: f32[8,2], index: 5, kind: output, shape index: {}]  }
   0x1   :  { %v22_v0 = vld [vmem:[%s223_s1 + $0x8] sm:$0x3]  ;;  %v21_v1 = vld [vmem:[%s223_s1] sm:$0xff]  ;;  %v63_v3 = vld [vmem:[%s225_s3 + $0x38] sm:$0xff]  ;;  %141 = vset.pattern.permute.xlu0 %v150_v18  ;;  %142 = vset.pattern.permute.xlu1 %v150_v18  ;;  %vm130_vm7 = vcmask 15360  }
   0x2   :  { %136 = vmatpush.msk.msra.mxu0 %vm31_vm0, %v22_v0  ;;  %v20_v2 = vld [vmem:[%s224_s0] sm:$0xff]  ;;  %v62_v4 = vld [vmem:[%s225_s3 + $0x30] sm:$0xff]  ;;  %80 = vmatpush.msra.mxu1 %v63_v3  ;;  %v61_v5 = vld [vmem:[%s225_s3 + $0x28] sm:$0xff] }
   0x3   :  { %v60_v6 = vld [vmem:[%s225_s3 + $0x20] sm:$0xff]  ;;  %v59_v7 = vld [vmem:[%s225_s3 + $0x18] sm:$0xff]  ;;  %v58_v8 = vld [vmem:[%s225_s3 + $0x10] sm:$0xff] }
   0x4   :  { %50 = vmatpush.msra.mxu0 %v21_v1  ;;  %81 = vmatpush.msra.mxu1 %v62_v4  ;;  %v57_v9 = vld [vmem:[%s225_s3 + $0x8] sm:$0xff]  ;;  %v56_v10 = vld [vmem:[%s225_s3] sm:$0xff] }
   0x5   :  { %137 = vmatmul.msk.f32.vlgmr.msra.gmra.mxu0 %vm27_vm1, %v20_v2  ;;  %v143_v11 = vld [vmem:[%s226_s2] ss:$0 sm:$0xff] }
   0x6   :  { %82 = vmatpush.msra.mxu1 %v61_v5  ;;  %v144_v15 = vld [vmem:[%s227_s4] ss:$0 sm:$0xff] }
   0x8   :  { %83 = vmatpush.msra.mxu1 %v60_v6 }
   0xa   :  { %84 = vmatpush.msra.mxu1 %v59_v7 }
   0xc   :  { %85 = vmatpush.msra.mxu1 %v58_v8 }
   0xe   :  { %86 = vmatpush.msra.mxu1 %v57_v9 }
  0x10   :  { %87 = vmatpush.msra.mxu1 %v56_v10 }
  0x82   :  { %v52_v12 = vpop.f32.mrf.mxu0 }
  0x83   :  { %v53_v13 = vadd.f32 %v143_v11, %v52_v12 }
  0x85   :  { %v55_v14 = vmax.f32 %v53_v13, 0.0 }
  0x87   :  { %138 = vmatmul.msk.f32.vlgmr.msra.gmra.mxu1 %vm68_vm2, %v55_v14 }
 0x104   :  { %v89_v16 = vpop.f32.mrf.mxu1 }
 0x105   :  { %v90_v17 = vadd.f32 %v144_v15, %v89_v16 }
 0x107   :  { %93 = vrot.lane.b32.xlu0 %v90_v17, %s149_s17 }
 0x179   :  { %v94_v19 = vpop.permute.xlu0 %93 }
 0x17a   :  { %v96_v20 = vmax.f32 %v90_v17, %v94_v19 }
 0x17c   :  { %99 = vperm.xlu0 %141, %v96_v20  }
 0x1ee   :  { %v100_v21 = vpop.permute.xlu0 %99 }
 0x1ef   :  { %v102_v22 = vsub.f32 %v90_v17, %v100_v21 }
 0x1f1   :  { %v103_v23 = vmul.f32 1.442695, %v102_v22 }
 0x1f3   :  { %145 = vpow2.f32 %v103_v23 }
 0x1f9   :  { %v146_v24 = vpop.eup %145 }
 0x1fa   :  { %106 = vrot.lane.b32.xlu1 %v146_v24, %s149_s17 }
 0x26c   :  { %v107_v25 = vpop.permute.xlu1 %106 }
 0x26d   :  { %v109_v26 = vadd.f32 %v146_v24, %v107_v25 }
 0x26f   :  { %112 = vperm.xlu1 %142, %v109_v26  }
 0x2e1   :  { %v113_v27 = vpop.permute.xlu1 %112 }
 0x2e2   :  { %147 = vrcp.f32 %v113_v27  ;;  %v126_v31 = vand.u32 2147483648, %v113_v27  ;;  %v124_v33 = vand.u32 2147483647, %v113_v27  ;;  %vm120_vm4 = vweird.f32 %v113_v27 }
 0x2e4   :  { %v127_v35 = vor.u32 1.1754944e-38, %v126_v31  ;;  %vm125_vm6 = vcmp.eq.f32.partialorder %v124_v33, 8.507059e+37 }
 0x2e8   :  { %v148_v28 = vpop.eup %147 }
 0x2e9   :  { %v116_v29 = vmul.f32 %v148_v28, %v113_v27  ;;  %vm121_vm3 = vweird.f32 %v148_v28 }
 0x2ea   :  { %vm122_vm5 = vmor %vm120_vm4, %vm121_vm3 }
 0x2eb   :  { %v117_v30 = vsub.f32 1.0, %v116_v29 }
 0x2ed   :  { %v118_v32 = vmul.f32 %v148_v28, %v117_v30 }
 0x2ef   :  { %v119_v34 = vadd.f32 %v148_v28, %v118_v32 }
 0x2f1   :  { %v123_v36 = vsel %vm122_vm5, %v148_v28, %v119_v34 }
 0x2f2   :  { %v128_v37 = vsel %vm125_vm6, %v127_v35, %v123_v36 }
 0x2f3   :  { %v129_v38 = vmul.f32 %v146_v24, %v128_v37 }
 0x2f5   :  { %131 = vst.msk [vmem:[%s228_s5] sm:$0xff] %vm130_vm7, %v129_v38 }

</bundles_post_ra>
